<compile_context>
chip_gen: v7x
topology: tpu7x:2x2x1
jax: 0.10.0
libtpu: 0.0.40
codegen_flags: <defaults>
</compile_context>

<pallas_src>
import functools

import jax
import jax.numpy as jnp
from jax import lax
from jax.experimental import pallas as pl
from jax.experimental.pallas import tpu as pltpu

LANE = 128     # TPU lane width (hidden/output columns live inside one 128-lane vreg)
HIDDEN = 16    # per-stream hidden width of the dueling QNetwork (fixed by the module)


def _round_up(n, m):
    return ((n + m - 1) // m) * m


def _packed_layout(state_size):
    """Row offsets of the packed parameter blocks (each starts on an 8-row tile)."""
    s_pad = _round_up(max(state_size, 1), 8)
    off_w1 = 0                       # rows [0, S)        : [wa1 | wv1] in cols [0:32)
    off_b1 = s_pad                   # row  off_b1        : [ba1 | bv1]
    off_w2 = s_pad + 8               # rows [off_w2,+32)  : block-diag [wa2 ; wv2]
    off_b2 = off_w2 + 2 * HIDDEN     # row  off_b2        : [ba2 | bv2]
    n_rows = off_b2 + 8
    return off_w1, off_b1, off_w2, off_b2, n_rows


def pack_params(params, state_size, action_size):
    """Pack all weights/biases into one lane-dense (n_rows, 128) f32 array.

    Layer 1: [wa1 | wv1] occupy columns [0:16) / [16:32).
    Layer 2 is block-diagonal over 32 rows: wa2 -> rows[0:16) x cols[0:A),
    wv2 -> rows[16:32) x col A. Every other entry is exactly zero, so one
    matmul per layer evaluates both streams; zero padding contributes nothing.
    Biases are kept in f32 rows (never cast).
    """
    S, H, A = state_size, HIDDEN, action_size
    off_w1, off_b1, off_w2, off_b2, n_rows = _packed_layout(S)
    p = jnp.zeros((n_rows, LANE), jnp.float32)
    # layer 1 weights / biases
    p = p.at[off_w1:off_w1 + S, 0:H].set(params["wa1"])
    p = p.at[off_w1:off_w1 + S, H:2 * H].set(params["wv1"])
    p = p.at[off_b1, 0:H].set(params["ba1"][0])
    p = p.at[off_b1, H:2 * H].set(params["bv1"][0])
    # layer 2 weights / biases (block diagonal: advantage cols [0:A), value col A)
    p = p.at[off_w2:off_w2 + H, 0:A].set(params["wa2"])
    p = p.at[off_w2 + H:off_w2 + 2 * H, A:A + 1].set(params["wv2"])
    p = p.at[off_b2, 0:A].set(params["ba2"][0])
    p = p.at[off_b2, A:A + 1].set(params["bv2"][0])
    return p


def qnetwork_kernel(x_ref, p_ref, out_ref, *, state_size, action_size,
                    compute_dtype, off_w1, off_b1, off_w2, off_b2):
    S, H, A = state_size, HIDDEN, action_size

    # In-kernel operand casts (VPU work hidden under the DMA pipeline); biases stay f32.
    x = x_ref[...].astype(compute_dtype)                              # (bm, S)
    w1 = p_ref[off_w1:off_w1 + S, :].astype(compute_dtype)            # (S, 128)
    b1 = p_ref[off_b1:off_b1 + 1, :]                                  # (1, 128) f32
    w2 = p_ref[off_w2:off_w2 + 2 * H, :].astype(compute_dtype)        # (32, 128)
    b2 = p_ref[off_b2:off_b2 + 1, :]                                  # (1, 128) f32

    # Layer 1, both streams in one MXU pass; f32 accumulation.
    h = jnp.dot(x, w1, preferred_element_type=jnp.float32) + b1       # (bm, 128)
    col = lax.broadcasted_iota(jnp.int32, h.shape, 1)
    # ReLU only on the advantage hidden (cols < 16); value hidden (cols 16:32) has
    # no ReLU — this matches the PyTorch module exactly.
    h = jnp.where(col < H, jnp.maximum(h, 0.0), h)

    # Layer 2, block-diagonal weights; contraction uses only the 32 live hidden cols.
    h2 = h[:, :2 * H].astype(compute_dtype)                           # (bm, 32)
    z = jnp.dot(h2, w2, preferred_element_type=jnp.float32) + b2      # (bm, 128)

    # cols [0:A) = ReLU(advantage logits); col A = value; remaining cols unused.
    adv = jnp.where(col < A, jnp.maximum(z, 0.0), 0.0)
    # Single fused lane reduction: corr = value - mean(adv).
    corr = jnp.sum(jnp.where(col == A, z, adv * (-1.0 / A)),
                   axis=1, keepdims=True)                             # (bm, 1)
    # Narrow (bm, A) store: only the useful lanes hit HBM.
    out_ref[...] = (adv[:, :A] + corr).astype(out_ref.dtype)


def qnetwork_forward(x, packed_params, state_size, action_size, *,
                     block_b=4096, compute_dtype=jnp.bfloat16):
    """Dueling-QNetwork forward as one Pallas call.

    x: (B, state_size); packed_params: output of pack_params (f32, stays f32).
    compute_dtype: dtype of the MXU operands (bf16 recommended on all chips —
    the MXU is bf16-native; accumulation / biases / epilogue stay f32).
    """
    B, S = x.shape
    assert S == state_size
    assert action_size + 1 <= LANE and 2 * HIDDEN <= LANE

    off_w1, off_b1, off_w2, off_b2, n_rows = _packed_layout(S)
    assert packed_params.shape == (n_rows, LANE)

    # ---- batch tile (bm) selection ------------------------------------------
    if B <= 16:
        bm = B                                   # one full-extent block (act()-style)
    else:
        # >= 2 grid steps so the "parallel" axis shards across both TCs on v7x.
        bm = min(_round_up(block_b, 8), _round_up(pl.cdiv(B, 2), 8))
        # Keep double-buffered in+out tiles well under the scoped-VMEM default
        # (v7x has only 64 MiB physical / 32 MiB scoped by default).
        bytes_per_row = 2 * 4 * (S + action_size)        # dbl-buffered f32 in + out
        vmem_cap_rows = max(8, ((8 << 20) // bytes_per_row) // 8 * 8)
        bm = max(8, min(bm, vmem_cap_rows))
    n_blocks = pl.cdiv(B, bm)            # ragged last block: OOB rows masked by Pallas

    kernel = functools.partial(
        qnetwork_kernel, state_size=S, action_size=action_size,
        compute_dtype=compute_dtype,
        off_w1=off_w1, off_b1=off_b1, off_w2=off_w2, off_b2=off_b2)

    return pl.pallas_call(
        kernel,
        out_shape=jax.ShapeDtypeStruct((B, action_size), jnp.float32),
        grid=(n_blocks,),
        in_specs=[
            pl.BlockSpec((bm, S), lambda i: (i, 0)),          # batch-tiled activations
            pl.BlockSpec((n_rows, LANE), lambda i: (0, 0)),   # packed weights stay resident
        ],
        out_specs=pl.BlockSpec((bm, action_size), lambda i: (i, 0)),
        compiler_params=pltpu.CompilerParams(
            dimension_semantics=("parallel",),   # megacore-shard batch tiles on v7x
        ),
    )(x, packed_params)


def init_params(key, state_size, action_size, hidden=HIDDEN):
    """Deterministic init mimicking nn.Linear's U(-1/sqrt(fan_in), 1/sqrt(fan_in))."""
    def linear(key, fan_in, fan_out):
        kw, kb = jax.random.split(key)
        bound = 1.0 / jnp.sqrt(jnp.float32(fan_in))
        w = jax.random.uniform(kw, (fan_in, fan_out), jnp.float32, -bound, bound)
        b = jax.random.uniform(kb, (1, fan_out), jnp.float32, -bound, bound)
        return w, b

    k1, k2, k3, k4 = jax.random.split(key, 4)
    wa1, ba1 = linear(k1, state_size, hidden)
    wa2, ba2 = linear(k2, hidden, action_size)
    wv1, bv1 = linear(k3, state_size, hidden)
    wv2, bv2 = linear(k4, hidden, 1)
    return dict(wa1=wa1, ba1=ba1, wa2=wa2, ba2=ba2,
                wv1=wv1, bv1=bv1, wv2=wv2, bv2=bv2)


def qnetwork_reference(x, p):
    """Pure-JAX reference matching the PyTorch forward."""
    x = x.astype(jnp.float32)
    a = jnp.maximum(x @ p["wa1"] + p["ba1"], 0.0)
    a = jnp.maximum(a @ p["wa2"] + p["ba2"], 0.0)
    v = (x @ p["wv1"] + p["bv1"]) @ p["wv2"] + p["bv2"]
    return v + a - jnp.mean(a, axis=1, keepdims=True)


if __name__ == "__main__":
    key = jax.random.PRNGKey(0)
    kx, kp, kb = jax.random.split(key, 3)

    state_size, action_size = 8, 4
    params = init_params(kp, state_size, action_size)
    packed = pack_params(params, state_size, action_size)

    # Small act()-style batch: single full-extent block, no padding anywhere.
    x_small = jax.random.normal(kx, (2, state_size), jnp.float32)
    ref_small = qnetwork_reference(x_small, params)
    out_small = jax.block_until_ready(
        qnetwork_forward(x_small, packed, state_size, action_size,
                         compute_dtype=jnp.float32))
    assert out_small.shape == (2, action_size)
    assert jnp.allclose(out_small, ref_small, atol=1e-4, rtol=1e-4)

    # Training-style batch: exercises the 2-block "parallel" grid + ragged last block.
    x_big = jax.random.normal(kb, (1030, state_size), jnp.float32)
    ref_big = qnetwork_reference(x_big, params)
    out_big = jax.block_until_ready(
        qnetwork_forward(x_big, packed, state_size, action_size,
                         compute_dtype=jnp.float32))
    assert out_big.shape == (1030, action_size)
    assert jnp.allclose(out_big, ref_big, atol=1e-4, rtol=1e-4)

    # bf16 matmul operands (MXU-native on v5e/v6e/v7x); f32 accumulate/bias/epilogue.
    out_bf16 = jax.block_until_ready(
        qnetwork_forward(x_big, packed, state_size, action_size,
                         compute_dtype=jnp.bfloat16))
    assert jnp.allclose(out_bf16, ref_big, atol=3e-2, rtol=3e-2)

    print("KERNEL_OK")
</pallas_src>

<mosaic_0001>
module attributes {stable_mosaic.version = 11 : i64} {
  func.func @qnetwork_kernel(%arg0: i32, %arg1: memref<2x8xf32, #tpu.memory_space<vmem>>, %arg2: memref<56x128xf32, #tpu.memory_space<vmem>>, %arg3: memref<2x4xf32, #tpu.memory_space<vmem>>) attributes {dimension_semantics = [#tpu.dimension_semantics<parallel>], iteration_bounds = array<i64: 1>, scalar_prefetch = 0 : i64, scratch_operands = 0 : i64, tpu.core_type = #tpu.core_type<tc>, window_params = [{transform_indices = @transform_0, window_bounds = array<i64: 2, 8>}, {pipeline_mode = #tpu.pipeline_mode<synchronous>, transform_indices = @transform_1, window_bounds = array<i64: 56, 128>}, {transform_indices = @transform_2, window_bounds = array<i64: 2, 4>}]} {
    %c0 = arith.constant 0 : index
    %c0_0 = arith.constant 0 : index
    %0 = vector.load %arg1[%c0, %c0_0] : memref<2x8xf32, #tpu.memory_space<vmem>>, vector<2x8xf32>
    %c0_1 = arith.constant 0 : index
    %c0_2 = arith.constant 0 : index
    %1 = vector.load %arg2[%c0_1, %c0_2] : memref<56x128xf32, #tpu.memory_space<vmem>>, vector<8x128xf32>
    %c8 = arith.constant 8 : index
    %c0_3 = arith.constant 0 : index
    %2 = vector.load %arg2[%c8, %c0_3] : memref<56x128xf32, #tpu.memory_space<vmem>>, vector<1x128xf32>
    %c16 = arith.constant 16 : index
    %c0_4 = arith.constant 0 : index
    %3 = vector.load %arg2[%c16, %c0_4] : memref<56x128xf32, #tpu.memory_space<vmem>>, vector<32x128xf32>
    %c48 = arith.constant 48 : index
    %c0_5 = arith.constant 0 : index
    %4 = vector.load %arg2[%c48, %c0_5] : memref<56x128xf32, #tpu.memory_space<vmem>>, vector<1x128xf32>
    %cst = arith.constant dense<0.000000e+00> : vector<2x128xf32>
    %5 = tpu.matmul %0, %1, %cst {dimension_numbers = #tpu.dot_dimension_numbers<[1], [0], [0], [1], [0, 0, 1, 1], [], []>} : vector<2x8xf32>, vector<8x128xf32>, vector<2x128xf32> -> vector<2x128xf32>
    %6 = vector.broadcast %2 : vector<1x128xf32> to vector<2x128xf32>
    %7 = arith.addf %5, %6 : vector<2x128xf32>
    %8 = tpu.iota {dimensions = array<i32: 1>} : vector<2x128xi32>
    %c16_i32 = arith.constant 16 : i32
    %9 = vector.broadcast %c16_i32 : i32 to vector<2x128xi32>
    %10 = arith.cmpi slt, %8, %9 : vector<2x128xi32>
    %cst_6 = arith.constant 0.000000e+00 : f32
    %11 = vector.broadcast %cst_6 : f32 to vector<2x128xf32>
    %12 = arith.maximumf %7, %11 : vector<2x128xf32>
    %13 = arith.select %10, %12, %7 : vector<2x128xi1>, vector<2x128xf32>
    %14 = vector.extract_strided_slice %13 {offsets = [0, 0], sizes = [2, 32], strides = [1, 1]} : vector<2x128xf32> to vector<2x32xf32>
    %cst_7 = arith.constant dense<0.000000e+00> : vector<2x128xf32>
    %15 = tpu.matmul %14, %3, %cst_7 {dimension_numbers = #tpu.dot_dimension_numbers<[1], [0], [0], [1], [0, 0, 1, 1], [], []>} : vector<2x32xf32>, vector<32x128xf32>, vector<2x128xf32> -> vector<2x128xf32>
    %16 = vector.broadcast %4 : vector<1x128xf32> to vector<2x128xf32>
    %17 = arith.addf %15, %16 : vector<2x128xf32>
    %c4_i32 = arith.constant 4 : i32
    %18 = vector.broadcast %c4_i32 : i32 to vector<2x128xi32>
    %19 = arith.cmpi slt, %8, %18 : vector<2x128xi32>
    %cst_8 = arith.constant 0.000000e+00 : f32
    %20 = vector.broadcast %cst_8 : f32 to vector<2x128xf32>
    %21 = arith.maximumf %17, %20 : vector<2x128xf32>
    %cst_9 = arith.constant 0.000000e+00 : f32
    %22 = vector.broadcast %cst_9 : f32 to vector<2x128xf32>
    %23 = arith.select %19, %21, %22 : vector<2x128xi1>, vector<2x128xf32>
    %c4_i32_10 = arith.constant 4 : i32
    %24 = vector.broadcast %c4_i32_10 : i32 to vector<2x128xi32>
    %25 = arith.cmpi eq, %8, %24 : vector<2x128xi32>
    %cst_11 = arith.constant -2.500000e-01 : f32
    %26 = vector.broadcast %cst_11 : f32 to vector<2x128xf32>
    %27 = arith.mulf %23, %26 : vector<2x128xf32>
    %28 = arith.select %25, %17, %27 : vector<2x128xi1>, vector<2x128xf32>
    %cst_12 = arith.constant dense<0.000000e+00> : vector<2xf32>
    %29 = vector.multi_reduction <add>, %28, %cst_12 [1] : vector<2x128xf32> to vector<2xf32>
    %30 = vector.shape_cast %29 : vector<2xf32> to vector<2x1xf32>
    %31 = vector.extract_strided_slice %23 {offsets = [0, 0], sizes = [2, 4], strides = [1, 1]} : vector<2x128xf32> to vector<2x4xf32>
    %32 = vector.broadcast %30 : vector<2x1xf32> to vector<2x4xf32>
    %33 = arith.addf %31, %32 : vector<2x4xf32>
    %c0_13 = arith.constant 0 : index
    %c0_14 = arith.constant 0 : index
    %34 = vector.load %arg3[%c0_13, %c0_14] : memref<2x4xf32, #tpu.memory_space<vmem>>, vector<2x4xf32>
    tpu.vector_store %arg3[%c0_13, %c0_14], %33 {strides = array<i32>} : memref<2x4xf32, #tpu.memory_space<vmem>>, vector<2x4xf32>,
    return
  }
  func.func @transform_0(%arg0: i32) -> (i32, i32) {
    %c0_i32 = arith.constant 0 : i32
    %c0_i32_0 = arith.constant 0 : i32
    return %arg0, %c0_i32 : i32, i32
  }
  func.func @transform_1(%arg0: i32) -> (i32, i32) {
    %c0_i32 = arith.constant 0 : i32
    %c0_i32_0 = arith.constant 0 : i32
    %c0_i32_1 = arith.constant 0 : i32
    return %c0_i32, %c0_i32_0 : i32, i32
  }
  func.func @transform_2(%arg0: i32) -> (i32, i32) {
    %c0_i32 = arith.constant 0 : i32
    %c0_i32_0 = arith.constant 0 : i32
    return %arg0, %c0_i32 : i32, i32
  }
}

</mosaic_0001>

<bundles_post_ra>
// kernel: tpu_custom_call.1
= control target key start
LH: loop header
LB: loop body
LE: loop exit
PB: predicated region body
PF: predicated region fallthrough
CT: control target
= control target key end

     0   :  { %7 = vsyncpa [#allocation3], 0  ;;  %s415_s0 = inlined_call_operand.hbm [shape: f32[2,8], index: 0, kind: input, shape index: {}]   ;;  %s416_s1 = inlined_call_operand.hbm [shape: f32[56,128], index: 1, kind: input, shape index: {}]   ;;  %s417_s2 = inlined_call_operand.hbm [shape: f32[2,4], index: 2, kind: output, shape index: {}]  }
   0x1   :  { %8 = vsyncpa [#allocation6], 0 }
   0x2   :  { %9 = vsyncpa [#allocation4], 0  ;;  %s349_s9 = smov [#allocation2]   ;;  %s350_s11 = smov [#allocation5]  }
   0x3   :  { %s16_s10 = sshll.u32 %s349_s9, 4  ;;  %s25_s12 = sshll.u32 %s350_s11, 4  ;;  %s17_s10 = int_to_ptr.vmem [resolvable:$true] %s16_s10  ;;  %s372_s12 = int_to_ptr.vmem [resolvable:$true] %s25_s12 }
   0x4   :  { %s277_s15 = scalar_lea.hbm %s415_s0, 32 }
   0x5   :  { %p278_p0 = scmp.ne.s32.totalorder %s415_s0, %s277_s15  ;;  %p281_p1 = scmp.lt.u32.totalorder %s277_s15, %s415_s0 }
   0x7   :  { %p283_p2 = pnand %p281_p1, %p278_p0 }
   0x9   :  { %286 = shalt.err (!%p283_p2)
}
   0xa   :  { %s287_s20 = scalar_lea.vmem %s17_s10, 32  ;;  %p292_p4 = scmp.lt.s32.totalorder %s17_s10, %s17_s10 }
   0xb   :  { %p288_p3 = scmp.ne.s32.totalorder %s17_s10, %s287_s20  ;;  %p293_p5 = scmp.lt.s32.totalorder %s287_s20, %s287_s20 }
   0xd   :  { %p294_p6 = por %p293_p5, %p292_p4 }
   0xf   :  { %p295_p7 = pnand %p294_p6, %p288_p3 }
  0x11   :  { %298 = shalt.err (!%p295_p7)
}
  0x12   :  { %19 = dma.hbm_to_vmem [thread:$0]  %s415_s0, 32, %s17_s10, [#allocation3]  }
  0x13   :  { %s299_s25 = scalar_lea.hbm %s416_s1, 896 }
  0x14   :  { %p300_p8 = scmp.ne.s32.totalorder %s416_s1, %s299_s25  ;;  %p303_p9 = scmp.lt.u32.totalorder %s299_s25, %s416_s1 }
  0x16   :  { %p305_p10 = pnand %p303_p9, %p300_p8 }
  0x18   :  { %308 = shalt.err (!%p305_p10)
}
  0x19   :  { %s309_s30 = scalar_lea.vmem %s372_s12, 896  ;;  %p314_p12 = scmp.lt.s32.totalorder %s372_s12, %s372_s12 }
  0x1a   :  { %p310_p11 = scmp.ne.s32.totalorder %s372_s12, %s309_s30  ;;  %p315_p13 = scmp.lt.s32.totalorder %s309_s30, %s309_s30 }
  0x1c   :  { %p316_p0 = por %p315_p13, %p314_p12 }
  0x1e   :  { %p317_p1 = pnand %p316_p0, %p310_p11 }
  0x20   :  { %320 = shalt.err (!%p317_p1)
}
  0x21   :  { %s351_s0 = smov 128   ;;  %s352_s3 = smov 8  }
  0x22   :  { %31 = dma.hbm_to_vmem [thread:$0]  %s416_s1, 896, %s372_s12, [#allocation6], %s351_s0, %s351_s0, %s352_s3  }
  0x23   :  { %343 = dma.done.wait [#allocation3], 32  }
  0x24   :  { %344 = vsyncadd [#allocation3], 4294967264 }
  0x25   :  { %345 = dma.done.wait [#allocation6], 896  }
  0x26   :  { %346 = vsyncadd [#allocation6], 4294966400  ;;  %v353_v0 = vmov 0.0   ;;  %vm354_vm0 = vmmov 0   ;;  %v355_v1 = vmov 0.0|0.0   ;;  %vm50_vm1 = vcmask 64512  }
  0x27   :  { %247 = vmatprep.subr.mxu0 %v353_v0  ;;  %249 = vmatprep.mubr.msk.f32.mxu0 %vm354_vm0, %v353_v0  ;;  %v39_v2 = vld [vmem:[#allocation5] sm:$0xff]  ;;  %v38_v3 = vld [vmem:[#allocation2] sm:$0x3]  ;;  %v41_v4 = vld [vmem:[#allocation5 + $0x10] sm:$0xff]  ;;  %v124_v10 = vlaneseq  ;;  %vm133_vm3 = vcmask 261120   ;;  %vm213_vm6 = vcmask 1041408  }
  0x28   :  { %263 = vmatprep.subr.bf16.mxu1 %v355_v1  ;;  %260 = vmatprep.mubr.msk.f32.mxu1 %vm354_vm0, %v353_v0  ;;  %v42_v5 = vld [vmem:[#allocation5 + $0x18] sm:$0xff]  ;;  %v43_v7 = vld [vmem:[#allocation5 + $0x20] sm:$0xff]  ;;  %v44_v8 = vld [vmem:[#allocation5 + $0x28] sm:$0xff]  ;;  %s356_s1 = smov [#allocation7]   ;;  %vm218_vm7 = vcmask 25600  }
  0x29   :  { %248 = vmatpush3.msra.mxu0 %v39_v2  ;;  %v264_v6 = vpack.c.bf16 %v42_v5, %v41_v4  ;;  %v267_v9 = vpack.c.bf16 %v44_v8, %v43_v7  ;;  %v236_v11 = vld [vmem:[#allocation5 + $0x8] ss:$0 sm:$0xff]  ;;  %v125_v12 = vand.u32 127, %v124_v10  ;;  %v238_v18 = vld [vmem:[#allocation5 + $0x30] ss:$0 sm:$0xff]  ;;  %s226_s6 = sshll.u32 %s356_s1, 4  ;;  %s227_s6 = int_to_ptr.vmem [resolvable:$true] %s226_s6 }
  0x2a   :  { %250 = vmatmul.mubr.msk.f32.vlgmr.msra.gmra.mrb[0].mxu0 %vm50_vm1, %v38_v3  ;;  %s321_s7 = scalar_lea.vmem %s227_s6, 32  ;;  %p326_p3 = scmp.lt.s32.totalorder %s227_s6, %s227_s6 }
  0x2b   :  { %265 = vmatpush3.bf16.msra.mxu1 %v264_v6  ;;  %vm126_vm2 = vcmp.lt.s32.totalorder %v125_v12, 16  ;;  %vm207_vm4 = vcmp.lt.s32.totalorder %v125_v12, 4  ;;  %vm210_vm5 = vcmp.eq.s32.totalorder %v125_v12, 4  ;;  %p322_p2 = scmp.ne.s32.totalorder %s227_s6, %s321_s7  ;;  %p327_p4 = scmp.lt.s32.totalorder %s321_s7, %s321_s7 }
  0x2c   :  { %266 = vmatprep.subr.bf16.mxu1 %v355_v1 }
  0x2d   :  { %p328_p5 = por %p327_p4, %p326_p3 }
  0x2f   :  { %268 = vmatpush3.bf16.msra.mxu1 %v267_v9  ;;  %p329_p6 = pnand %p328_p5, %p322_p2 }
  0xfd   :  { %v120_v13 = vpop.f32.mrb[0].mxu0 }
  0xfe   :  { %v121_v14 = vadd.f32 %v236_v11, %v120_v13  ;;  %v251_v15 = vpop.f32.mrb[1].mxu0 }
 0x100   :  { %v127_v16 = vmax.f32 %v121_v14, 0.0 }
 0x102   :  { %v128_v17 = vsel %vm126_vm2, %v127_v16, %v121_v14 }
 0x103   :  { %261 = vmatmul.mubr.msk.f32.vlgmr.msra.gmra.mrb[0].mxu1 %vm133_vm3, %v128_v17 }
 0x1d6   :  { %v203_v19 = vpop.f32.mrb[0].mxu1 }
 0x1d7   :  { %v204_v20 = vadd.f32 %v238_v18, %v203_v19  ;;  %v262_v21 = vpop.f32.mrb[1].mxu1 }
 0x1d9   :  { %v208_v22 = vmax.f32 %v204_v20, 0.0 }
 0x1db   :  { %v209_v23 = vsel %vm207_vm4, %v208_v22, 0.0 }
 0x1dc   :  { %v211_v24 = vmul.f32 -0.25, %v209_v23 }
 0x1de   :  { %v212_v25 = vsel %vm210_vm5, %v204_v20, %v211_v24 }
 0x1df   :  { %v214_v26 = vsel %vm213_vm6, %v212_v25, 0.0 }
 0x1e0   :  { %215 = vadd.xlane.f32.xlu0 %v214_v26 }
 0x26d   :  { %v216_v27 = vpop.xlane.xlu0 %215 }
 0x26e   :  { %v217_v28 = vadd.f32 %v216_v27, %v209_v23 }
 0x270   :  { %219 = vst.msk [vmem:[#allocation7] sm:$0x3] %vm218_vm7, %v217_v28 }
 0x271   :  { %332 = shalt.err (!%p329_p6)
}
 0x272   :  { %s333_s10 = scalar_lea.hbm %s417_s2, 32 }
 0x273   :  { %p334_p7 = scmp.ne.s32.totalorder %s417_s2, %s333_s10  ;;  %p337_p8 = scmp.lt.u32.totalorder %s333_s10, %s417_s2 }
 0x275   :  { %p339_p9 = pnand %p337_p8, %p334_p7 }
 0x277   :  { %342 = shalt.err (!%p339_p9)
}
 0x278   :  { %229 = dma.vmem_to_hbm [thread:$0]  %s227_s6, 32, %s417_s2, [#allocation4]  }
 0x279   :  { %347 = dma.done.wait [#allocation4], 32  }
 0x27a   :  { %348 = vsyncadd [#allocation4], 4294967264 }
 0x27b   :  { %233 = vsyncpa [#allocation3], 1 }
 0x27c   :  { %234 = vsyncpa [#allocation6], 1 }
 0x27d   :  { %235 = vsyncpa [#allocation4], 1 }

</bundles_post_ra>
